<compile_context>
chip_gen: v7x
topology: tpu7x:2x2x1
jax: 0.10.0
libtpu: 0.0.40
codegen_flags: <defaults>
</compile_context>

<pallas_src>
import numpy as np
import jax
import jax.numpy as jnp
from jax.experimental import pallas as pl
from jax.experimental.pallas import tpu as pltpu


# ----------------------------------------------------------------------------
# Pallas kernel: two ContinuousConvolution layers over one batch of N points.
# knn gather realized as one-hot matmuls (MXU friendly, no dynamic gather).
# ----------------------------------------------------------------------------
def _three_d_branch_kernel(feats_ref, coors_ref, idx_ref,
                           wf1_ref, wf2_ref, wcpair_ref, wcsum_ref,
                           b1_ref, b2_ref, out_ref):
    f = feats_ref[0].astype(jnp.float32)     # (N, C)
    p = coors_ref[0].astype(jnp.float32)     # (N, 3)
    idx = idx_ref[0]                         # (N, K) int32
    N, C = f.shape
    K = idx.shape[1]

    # ---- hoisted, layer-invariant work --------------------------------------
    # K one-hot gather matrices, built once and shared by both layers.
    col = jax.lax.broadcasted_iota(jnp.int32, (N, N), 1)
    onehots = [(idx[:, k:k + 1] == col).astype(jnp.float32) for k in range(K)]

    # Folded coordinate contribution for BOTH layers (independent of layer
    # inputs):  coord_L = p @ (sum_k wcL_k) - sum_k onehot_k @ (p @ wcL_k).
    # wcpair_ref[k] = [wc1_k | wc2_k]  (3, 2C);  wcsum_ref = [sum wc1 | sum wc2].
    gpw = jnp.zeros((N, 2 * C), jnp.float32)
    for k in range(K):                                        # K static, unrolled
        pw_k = jnp.dot(p, wcpair_ref[k], preferred_element_type=jnp.float32)
        gpw = gpw + jnp.dot(onehots[k], pw_k,
                            preferred_element_type=jnp.float32)
    coord = jnp.dot(p, wcsum_ref[...],
                    preferred_element_type=jnp.float32) - gpw  # (N, 2C)
    coord1 = coord[:, :C]
    coord2 = coord[:, C:]

    # ---- one fused (N, K*C) @ (K*C, C) weight matmul per layer --------------
    def cc_layer(x, wf_flat_ref, coord_l, bias_ref):
        nf = jnp.concatenate(
            [jnp.dot(onehots[k], x, preferred_element_type=jnp.float32)
             for k in range(K)], axis=1)                       # (N, K*C)
        pre = (bias_ref[...] + coord_l
               + jnp.dot(nf, wf_flat_ref[...],
                         preferred_element_type=jnp.float32))
        return jnp.maximum(pre, 0.0) + x                       # ReLU + residual

    h = cc_layer(f, wf1_ref, coord1, b1_ref)
    h = cc_layer(h, wf2_ref, coord2, b2_ref)
    # TODO(synk): at production C, pad channels to a multiple of 128 (or pack
    #             rows into lanes) so this store is lane-dense, and cast the
    #             0/1 gather matrices + features to bf16 for the MXU.
    out_ref[0] = h.astype(out_ref.dtype)


def continuous_conv_branch(feats_pts, coors, indices, params):
    """feats_pts: (B, N, C) f32, coors: (B, N, 3) f32, indices: (B, N, K) i32."""
    B, N, C = feats_pts.shape
    K = indices.shape[2]
    wf1, wc1, b1, wf2, wc2, b2 = params

    # Wrapper-side weight layout plumbing (reshapes only, no input compute):
    wf1_flat = wf1.reshape(K * C, C)                     # rows k*C:(k+1)*C = wf1[k]
    wf2_flat = wf2.reshape(K * C, C)
    wc_pair = jnp.concatenate([wc1, wc2], axis=2)        # (K, 3, 2C): [wc1_k | wc2_k]
    wc_sum = jnp.concatenate([wc1.sum(axis=0), wc2.sum(axis=0)], axis=1)  # (3, 2C)

    resident = pl.BlockSpec(memory_space=pltpu.MemorySpace.VMEM)  # whole-array, no re-DMA

    return pl.pallas_call(
        _three_d_branch_kernel,
        out_shape=jax.ShapeDtypeStruct((B, N, C), feats_pts.dtype),
        grid_spec=pltpu.PrefetchScalarGridSpec(
            num_scalar_prefetch=0,
            grid=(B,),
            in_specs=[
                pl.BlockSpec((1, N, C), lambda b: (b, 0, 0)),   # feats
                pl.BlockSpec((1, N, 3), lambda b: (b, 0, 0)),   # coors
                pl.BlockSpec((1, N, K), lambda b: (b, 0, 0)),   # knn indices
                resident,   # wf1 (K*C, C)
                resident,   # wf2 (K*C, C)
                resident,   # wc_pair (K, 3, 2C)
                resident,   # wc_sum (3, 2C)
                resident,   # b1 (1, C)
                resident,   # b2 (1, C)
            ],
            out_specs=pl.BlockSpec((1, N, C), lambda b: (b, 0, 0)),
        ),
        compiler_params=pltpu.CompilerParams(
            dimension_semantics=("parallel",),          # batches independent -> v7x 2 TCs
            vmem_limit_bytes=32 * 1024 * 1024,
        ),
    )(feats_pts, coors, indices,
      wf1_flat, wf2_flat, wc_pair, wc_sum, b1, b2)


# ----------------------------------------------------------------------------
# JAX glue reproducing Three_D_Branch.forward:
#   pack masked pixels -> 2x ContinuousConvolution (Pallas) -> scatter back.
# ----------------------------------------------------------------------------
def three_d_branch_forward(feats, mask, coors, indices, params):
    """feats: (B, C, H, W), mask: (B, H, W) bool, coors: (B, N, 3), indices: (B, N, K)."""
    B, C, H, W = feats.shape
    N = coors.shape[1]

    nhwc = jnp.transpose(feats, (0, 2, 3, 1)).reshape(B, H * W, C)
    mflat = mask.reshape(B, H * W)
    # exactly N True entries per batch (required by the torch .view(B, -1, C))
    pix = jax.vmap(lambda m: jnp.nonzero(m, size=N)[0])(mflat)      # (B, N)
    feats_pts = jax.vmap(lambda f, i: f[i])(nhwc, pix)              # (B, N, C)

    pts_out = continuous_conv_branch(feats_pts, coors, indices, params)

    out_flat = jnp.zeros_like(nhwc)
    out_flat = jax.vmap(lambda o, i, v: o.at[i].set(v))(out_flat, pix, pts_out)
    return jnp.transpose(out_flat.reshape(B, H, W, C), (0, 3, 1, 2))


# ----------------------------------------------------------------------------
# Pure-JAX reference (same assumed ContinuousConvolution semantics).
# ----------------------------------------------------------------------------
def three_d_branch_reference(feats, mask, coors, indices, params):
    B, C, H, W = feats.shape
    N = coors.shape[1]
    wf1, wc1, b1, wf2, wc2, b2 = params

    nhwc = jnp.transpose(feats, (0, 2, 3, 1)).reshape(B, H * W, C)
    mflat = mask.reshape(B, H * W)
    pix = jax.vmap(lambda m: jnp.nonzero(m, size=N)[0])(mflat)
    fpts = jax.vmap(lambda f, i: f[i])(nhwc, pix)

    def cc(x, p, idx, wf, wc, b):
        nf = x[idx]                              # (N, K, C)
        nc = p[idx]                              # (N, K, 3)
        diff = p[:, None, :] - nc                # (N, K, 3)
        out = (jnp.einsum('nkc,kcd->nd', nf, wf)
               + jnp.einsum('nkt,ktd->nd', diff, wc) + b)
        return jnp.maximum(out, 0.0) + x

    def per_batch(x, p, idx):
        h = cc(x, p, idx, wf1, wc1, b1)
        h = cc(h, p, idx, wf2, wc2, b2)
        return h

    pts_out = jax.vmap(per_batch)(fpts, coors, indices)
    oflat = jnp.zeros_like(nhwc)
    oflat = jax.vmap(lambda o, i, v: o.at[i].set(v))(oflat, pix, pts_out)
    return jnp.transpose(oflat.reshape(B, H, W, C), (0, 3, 1, 2))


def init_params(key, C, K):
    fan_in = K * (C + 3)
    bound = 1.0 / np.sqrt(fan_in)
    ks = jax.random.split(key, 6)
    u = lambda k, s: jax.random.uniform(k, s, jnp.float32, -bound, bound)
    wf1, wc1, b1 = u(ks[0], (K, C, C)), u(ks[1], (K, 3, C)), u(ks[2], (1, C))
    wf2, wc2, b2 = u(ks[3], (K, C, C)), u(ks[4], (K, 3, C)), u(ks[5], (1, C))
    return (wf1, wc1, b1, wf2, wc2, b2)


if __name__ == "__main__":
    B, C, H, W = 2, 8, 8, 8      # n_feat = 8
    N, K = 16, 4                 # N masked points per batch, k_number = 4

    key = jax.random.PRNGKey(0)
    k_feat, k_coor, k_idx, k_mask, k_param = jax.random.split(key, 5)

    feats = jax.random.normal(k_feat, (B, C, H, W), jnp.float32)
    coors = jax.random.normal(k_coor, (B, N, 3), jnp.float32)
    indices = jax.random.randint(k_idx, (B, N, K), 0, N, jnp.int32)

    # mask with exactly N True pixels per batch element
    perm = jax.vmap(lambda k: jax.random.permutation(k, H * W))(
        jax.random.split(k_mask, B))
    pix_sel = perm[:, :N]
    mask = jnp.zeros((B, H * W), bool)
    mask = jax.vmap(lambda m, i: m.at[i].set(True))(mask, pix_sel)
    mask = mask.reshape(B, H, W)

    params = init_params(k_param, C, K)

    out = three_d_branch_forward(feats, mask, coors, indices, params)
    out = jax.block_until_ready(out)

    ref = three_d_branch_reference(feats, mask, coors, indices, params)
    np.testing.assert_allclose(np.asarray(out), np.asarray(ref),
                               rtol=1e-3, atol=1e-3)
    assert out.shape == (B, C, H, W)
    print("KERNEL_OK")
</pallas_src>

<mosaic_0001>
module attributes {stable_mosaic.version = 11 : i64} {
  func.func @_three_d_branch_kernel(%arg0: i32, %arg1: memref<1x16x8xf32, #tpu.memory_space<vmem>>, %arg2: memref<1x16x3xf32, #tpu.memory_space<vmem>>, %arg3: memref<1x16x4xi32, #tpu.memory_space<vmem>>, %arg4: memref<32x8xf32, #tpu.memory_space<vmem>>, %arg5: memref<32x8xf32, #tpu.memory_space<vmem>>, %arg6: memref<4x3x16xf32, #tpu.memory_space<vmem>>, %arg7: memref<3x16xf32, #tpu.memory_space<vmem>>, %arg8: memref<1x8xf32, #tpu.memory_space<vmem>>, %arg9: memref<1x8xf32, #tpu.memory_space<vmem>>, %arg10: memref<1x16x8xf32, #tpu.memory_space<vmem>>) attributes {dimension_semantics = [#tpu.dimension_semantics<parallel>], iteration_bounds = array<i64: 2>, scalar_prefetch = 0 : i64, scratch_operands = 0 : i64, tpu.core_type = #tpu.core_type<tc>, window_params = [{transform_indices = @transform_0, window_bounds = array<i64: 1, 16, 8>}, {transform_indices = @transform_1, window_bounds = array<i64: 1, 16, 3>}, {transform_indices = @transform_2, window_bounds = array<i64: 1, 16, 4>}, {pipeline_mode = #tpu.pipeline_mode<synchronous>, transform_indices = @transform_3, window_bounds = array<i64: 32, 8>}, {pipeline_mode = #tpu.pipeline_mode<synchronous>, transform_indices = @transform_4, window_bounds = array<i64: 32, 8>}, {pipeline_mode = #tpu.pipeline_mode<synchronous>, transform_indices = @transform_5, window_bounds = array<i64: 4, 3, 16>}, {pipeline_mode = #tpu.pipeline_mode<synchronous>, transform_indices = @transform_6, window_bounds = array<i64: 3, 16>}, {pipeline_mode = #tpu.pipeline_mode<synchronous>, transform_indices = @transform_7, window_bounds = array<i64: 1, 8>}, {pipeline_mode = #tpu.pipeline_mode<synchronous>, transform_indices = @transform_8, window_bounds = array<i64: 1, 8>}, {transform_indices = @transform_9, window_bounds = array<i64: 1, 16, 8>}]} {
    %c0 = arith.constant 0 : index
    %c0_0 = arith.constant 0 : index
    %c0_1 = arith.constant 0 : index
    %0 = vector.load %arg1[%c0, %c0_0, %c0_1] : memref<1x16x8xf32, #tpu.memory_space<vmem>>, vector<1x16x8xf32>
    %1 = vector.shape_cast %0 : vector<1x16x8xf32> to vector<16x8xf32>
    %c0_2 = arith.constant 0 : index
    %c0_3 = arith.constant 0 : index
    %c0_4 = arith.constant 0 : index
    %2 = vector.load %arg2[%c0_2, %c0_3, %c0_4] : memref<1x16x3xf32, #tpu.memory_space<vmem>>, vector<1x16x3xf32>
    %3 = vector.shape_cast %2 : vector<1x16x3xf32> to vector<16x3xf32>
    %c0_5 = arith.constant 0 : index
    %c0_6 = arith.constant 0 : index
    %c0_7 = arith.constant 0 : index
    %4 = vector.load %arg3[%c0_5, %c0_6, %c0_7] : memref<1x16x4xi32, #tpu.memory_space<vmem>>, vector<1x16x4xi32>
    %5 = vector.shape_cast %4 : vector<1x16x4xi32> to vector<16x4xi32>
    %6 = tpu.iota {dimensions = array<i32: 1>} : vector<16x16xi32>
    %7 = vector.extract_strided_slice %5 {offsets = [0, 0], sizes = [16, 1], strides = [1, 1]} : vector<16x4xi32> to vector<16x1xi32>
    %8 = vector.broadcast %7 : vector<16x1xi32> to vector<16x16xi32>
    %9 = arith.cmpi eq, %8, %6 : vector<16x16xi32>
    %10 = arith.extui %9 : vector<16x16xi1> to vector<16x16xi32>
    %11 = arith.sitofp %10 : vector<16x16xi32> to vector<16x16xf32>
    %12 = vector.extract_strided_slice %5 {offsets = [0, 1], sizes = [16, 1], strides = [1, 1]} : vector<16x4xi32> to vector<16x1xi32>
    %13 = vector.broadcast %12 : vector<16x1xi32> to vector<16x16xi32>
    %14 = arith.cmpi eq, %13, %6 : vector<16x16xi32>
    %15 = arith.extui %14 : vector<16x16xi1> to vector<16x16xi32>
    %16 = arith.sitofp %15 : vector<16x16xi32> to vector<16x16xf32>
    %17 = vector.extract_strided_slice %5 {offsets = [0, 2], sizes = [16, 1], strides = [1, 1]} : vector<16x4xi32> to vector<16x1xi32>
    %18 = vector.broadcast %17 : vector<16x1xi32> to vector<16x16xi32>
    %19 = arith.cmpi eq, %18, %6 : vector<16x16xi32>
    %20 = arith.extui %19 : vector<16x16xi1> to vector<16x16xi32>
    %21 = arith.sitofp %20 : vector<16x16xi32> to vector<16x16xf32>
    %22 = vector.extract_strided_slice %5 {offsets = [0, 3], sizes = [16, 1], strides = [1, 1]} : vector<16x4xi32> to vector<16x1xi32>
    %23 = vector.broadcast %22 : vector<16x1xi32> to vector<16x16xi32>
    %24 = arith.cmpi eq, %23, %6 : vector<16x16xi32>
    %25 = arith.extui %24 : vector<16x16xi1> to vector<16x16xi32>
    %26 = arith.sitofp %25 : vector<16x16xi32> to vector<16x16xf32>
    %cst = arith.constant 0.000000e+00 : f32
    %27 = vector.broadcast %cst : f32 to vector<16x16xf32>
    %c0_8 = arith.constant 0 : index
    %c0_9 = arith.constant 0 : index
    %c0_10 = arith.constant 0 : index
    %28 = vector.load %arg6[%c0_8, %c0_9, %c0_10] : memref<4x3x16xf32, #tpu.memory_space<vmem>>, vector<1x3x16xf32>
    %29 = vector.shape_cast %28 : vector<1x3x16xf32> to vector<3x16xf32>
    %cst_11 = arith.constant dense<0.000000e+00> : vector<16x16xf32>
    %30 = tpu.matmul %3, %29, %cst_11 {dimension_numbers = #tpu.dot_dimension_numbers<[1], [0], [0], [1], [0, 0, 1, 1], [], []>} : vector<16x3xf32>, vector<3x16xf32>, vector<16x16xf32> -> vector<16x16xf32>
    %cst_12 = arith.constant dense<0.000000e+00> : vector<16x16xf32>
    %31 = tpu.matmul %11, %30, %cst_12 {dimension_numbers = #tpu.dot_dimension_numbers<[1], [0], [0], [1], [0, 0, 1, 1], [], []>} : vector<16x16xf32>, vector<16x16xf32>, vector<16x16xf32> -> vector<16x16xf32>
    %32 = arith.addf %27, %31 : vector<16x16xf32>
    %c1 = arith.constant 1 : index
    %c0_13 = arith.constant 0 : index
    %c0_14 = arith.constant 0 : index
    %33 = vector.load %arg6[%c1, %c0_13, %c0_14] : memref<4x3x16xf32, #tpu.memory_space<vmem>>, vector<1x3x16xf32>
    %34 = vector.shape_cast %33 : vector<1x3x16xf32> to vector<3x16xf32>
    %cst_15 = arith.constant dense<0.000000e+00> : vector<16x16xf32>
    %35 = tpu.matmul %3, %34, %cst_15 {dimension_numbers = #tpu.dot_dimension_numbers<[1], [0], [0], [1], [0, 0, 1, 1], [], []>} : vector<16x3xf32>, vector<3x16xf32>, vector<16x16xf32> -> vector<16x16xf32>
    %cst_16 = arith.constant dense<0.000000e+00> : vector<16x16xf32>
    %36 = tpu.matmul %16, %35, %cst_16 {dimension_numbers = #tpu.dot_dimension_numbers<[1], [0], [0], [1], [0, 0, 1, 1], [], []>} : vector<16x16xf32>, vector<16x16xf32>, vector<16x16xf32> -> vector<16x16xf32>
    %37 = arith.addf %32, %36 : vector<16x16xf32>
    %c2 = arith.constant 2 : index
    %c0_17 = arith.constant 0 : index
    %c0_18 = arith.constant 0 : index
    %38 = vector.load %arg6[%c2, %c0_17, %c0_18] : memref<4x3x16xf32, #tpu.memory_space<vmem>>, vector<1x3x16xf32>
    %39 = vector.shape_cast %38 : vector<1x3x16xf32> to vector<3x16xf32>
    %cst_19 = arith.constant dense<0.000000e+00> : vector<16x16xf32>
    %40 = tpu.matmul %3, %39, %cst_19 {dimension_numbers = #tpu.dot_dimension_numbers<[1], [0], [0], [1], [0, 0, 1, 1], [], []>} : vector<16x3xf32>, vector<3x16xf32>, vector<16x16xf32> -> vector<16x16xf32>
    %cst_20 = arith.constant dense<0.000000e+00> : vector<16x16xf32>
    %41 = tpu.matmul %21, %40, %cst_20 {dimension_numbers = #tpu.dot_dimension_numbers<[1], [0], [0], [1], [0, 0, 1, 1], [], []>} : vector<16x16xf32>, vector<16x16xf32>, vector<16x16xf32> -> vector<16x16xf32>
    %42 = arith.addf %37, %41 : vector<16x16xf32>
    %c3 = arith.constant 3 : index
    %c0_21 = arith.constant 0 : index
    %c0_22 = arith.constant 0 : index
    %43 = vector.load %arg6[%c3, %c0_21, %c0_22] : memref<4x3x16xf32, #tpu.memory_space<vmem>>, vector<1x3x16xf32>
    %44 = vector.shape_cast %43 : vector<1x3x16xf32> to vector<3x16xf32>
    %cst_23 = arith.constant dense<0.000000e+00> : vector<16x16xf32>
    %45 = tpu.matmul %3, %44, %cst_23 {dimension_numbers = #tpu.dot_dimension_numbers<[1], [0], [0], [1], [0, 0, 1, 1], [], []>} : vector<16x3xf32>, vector<3x16xf32>, vector<16x16xf32> -> vector<16x16xf32>
    %cst_24 = arith.constant dense<0.000000e+00> : vector<16x16xf32>
    %46 = tpu.matmul %26, %45, %cst_24 {dimension_numbers = #tpu.dot_dimension_numbers<[1], [0], [0], [1], [0, 0, 1, 1], [], []>} : vector<16x16xf32>, vector<16x16xf32>, vector<16x16xf32> -> vector<16x16xf32>
    %47 = arith.addf %42, %46 : vector<16x16xf32>
    %c0_25 = arith.constant 0 : index
    %c0_26 = arith.constant 0 : index
    %48 = vector.load %arg7[%c0_25, %c0_26] : memref<3x16xf32, #tpu.memory_space<vmem>>, vector<3x16xf32>
    %cst_27 = arith.constant dense<0.000000e+00> : vector<16x16xf32>
    %49 = tpu.matmul %3, %48, %cst_27 {dimension_numbers = #tpu.dot_dimension_numbers<[1], [0], [0], [1], [0, 0, 1, 1], [], []>} : vector<16x3xf32>, vector<3x16xf32>, vector<16x16xf32> -> vector<16x16xf32>
    %50 = arith.subf %49, %47 : vector<16x16xf32>
    %51 = vector.extract_strided_slice %50 {offsets = [0, 0], sizes = [16, 8], strides = [1, 1]} : vector<16x16xf32> to vector<16x8xf32>
    %52 = vector.extract_strided_slice %50 {offsets = [0, 8], sizes = [16, 8], strides = [1, 1]} : vector<16x16xf32> to vector<16x8xf32>
    %cst_28 = arith.constant dense<0.000000e+00> : vector<16x8xf32>
    %53 = tpu.matmul %11, %1, %cst_28 {dimension_numbers = #tpu.dot_dimension_numbers<[1], [0], [0], [1], [0, 0, 1, 1], [], []>} : vector<16x16xf32>, vector<16x8xf32>, vector<16x8xf32> -> vector<16x8xf32>
    %cst_29 = arith.constant dense<0.000000e+00> : vector<16x8xf32>
    %54 = tpu.matmul %16, %1, %cst_29 {dimension_numbers = #tpu.dot_dimension_numbers<[1], [0], [0], [1], [0, 0, 1, 1], [], []>} : vector<16x16xf32>, vector<16x8xf32>, vector<16x8xf32> -> vector<16x8xf32>
    %cst_30 = arith.constant dense<0.000000e+00> : vector<16x8xf32>
    %55 = tpu.matmul %21, %1, %cst_30 {dimension_numbers = #tpu.dot_dimension_numbers<[1], [0], [0], [1], [0, 0, 1, 1], [], []>} : vector<16x16xf32>, vector<16x8xf32>, vector<16x8xf32> -> vector<16x8xf32>
    %cst_31 = arith.constant dense<0.000000e+00> : vector<16x8xf32>
    %56 = tpu.matmul %26, %1, %cst_31 {dimension_numbers = #tpu.dot_dimension_numbers<[1], [0], [0], [1], [0, 0, 1, 1], [], []>} : vector<16x16xf32>, vector<16x8xf32>, vector<16x8xf32> -> vector<16x8xf32>
    %57 = tpu.concatenate %53, %54, %55, %56 in 1 : vector<16x8xf32>, vector<16x8xf32>, vector<16x8xf32>, vector<16x8xf32> -> vector<16x32xf32>
    %c0_32 = arith.constant 0 : index
    %c0_33 = arith.constant 0 : index
    %58 = vector.load %arg8[%c0_32, %c0_33] : memref<1x8xf32, #tpu.memory_space<vmem>>, vector<1x8xf32>
    %59 = vector.broadcast %58 : vector<1x8xf32> to vector<16x8xf32>
    %60 = arith.addf %59, %51 : vector<16x8xf32>
    %c0_34 = arith.constant 0 : index
    %c0_35 = arith.constant 0 : index
    %61 = vector.load %arg4[%c0_34, %c0_35] : memref<32x8xf32, #tpu.memory_space<vmem>>, vector<32x8xf32>
    %cst_36 = arith.constant dense<0.000000e+00> : vector<16x8xf32>
    %62 = tpu.matmul %57, %61, %cst_36 {dimension_numbers = #tpu.dot_dimension_numbers<[1], [0], [0], [1], [0, 0, 1, 1], [], []>} : vector<16x32xf32>, vector<32x8xf32>, vector<16x8xf32> -> vector<16x8xf32>
    %63 = arith.addf %60, %62 : vector<16x8xf32>
    %cst_37 = arith.constant 0.000000e+00 : f32
    %64 = vector.broadcast %cst_37 : f32 to vector<16x8xf32>
    %65 = arith.maximumf %63, %64 : vector<16x8xf32>
    %66 = arith.addf %65, %1 : vector<16x8xf32>
    %cst_38 = arith.constant dense<0.000000e+00> : vector<16x8xf32>
    %67 = tpu.matmul %11, %66, %cst_38 {dimension_numbers = #tpu.dot_dimension_numbers<[1], [0], [0], [1], [0, 0, 1, 1], [], []>} : vector<16x16xf32>, vector<16x8xf32>, vector<16x8xf32> -> vector<16x8xf32>
    %cst_39 = arith.constant dense<0.000000e+00> : vector<16x8xf32>
    %68 = tpu.matmul %16, %66, %cst_39 {dimension_numbers = #tpu.dot_dimension_numbers<[1], [0], [0], [1], [0, 0, 1, 1], [], []>} : vector<16x16xf32>, vector<16x8xf32>, vector<16x8xf32> -> vector<16x8xf32>
    %cst_40 = arith.constant dense<0.000000e+00> : vector<16x8xf32>
    %69 = tpu.matmul %21, %66, %cst_40 {dimension_numbers = #tpu.dot_dimension_numbers<[1], [0], [0], [1], [0, 0, 1, 1], [], []>} : vector<16x16xf32>, vector<16x8xf32>, vector<16x8xf32> -> vector<16x8xf32>
    %cst_41 = arith.constant dense<0.000000e+00> : vector<16x8xf32>
    %70 = tpu.matmul %26, %66, %cst_41 {dimension_numbers = #tpu.dot_dimension_numbers<[1], [0], [0], [1], [0, 0, 1, 1], [], []>} : vector<16x16xf32>, vector<16x8xf32>, vector<16x8xf32> -> vector<16x8xf32>
    %71 = tpu.concatenate %67, %68, %69, %70 in 1 : vector<16x8xf32>, vector<16x8xf32>, vector<16x8xf32>, vector<16x8xf32> -> vector<16x32xf32>
    %c0_42 = arith.constant 0 : index
    %c0_43 = arith.constant 0 : index
    %72 = vector.load %arg9[%c0_42, %c0_43] : memref<1x8xf32, #tpu.memory_space<vmem>>, vector<1x8xf32>
    %73 = vector.broadcast %72 : vector<1x8xf32> to vector<16x8xf32>
    %74 = arith.addf %73, %52 : vector<16x8xf32>
    %c0_44 = arith.constant 0 : index
    %c0_45 = arith.constant 0 : index
    %75 = vector.load %arg5[%c0_44, %c0_45] : memref<32x8xf32, #tpu.memory_space<vmem>>, vector<32x8xf32>
    %cst_46 = arith.constant dense<0.000000e+00> : vector<16x8xf32>
    %76 = tpu.matmul %71, %75, %cst_46 {dimension_numbers = #tpu.dot_dimension_numbers<[1], [0], [0], [1], [0, 0, 1, 1], [], []>} : vector<16x32xf32>, vector<32x8xf32>, vector<16x8xf32> -> vector<16x8xf32>
    %77 = arith.addf %74, %76 : vector<16x8xf32>
    %cst_47 = arith.constant 0.000000e+00 : f32
    %78 = vector.broadcast %cst_47 : f32 to vector<16x8xf32>
    %79 = arith.maximumf %77, %78 : vector<16x8xf32>
    %80 = arith.addf %79, %66 : vector<16x8xf32>
    %c0_48 = arith.constant 0 : index
    %c0_49 = arith.constant 0 : index
    %c0_50 = arith.constant 0 : index
    %81 = vector.load %arg10[%c0_48, %c0_49, %c0_50] : memref<1x16x8xf32, #tpu.memory_space<vmem>>, vector<1x16x8xf32>
    %82 = vector.shape_cast %81 : vector<1x16x8xf32> to vector<16x8xf32>
    %83 = vector.shape_cast %80 : vector<16x8xf32> to vector<1x16x8xf32>
    tpu.vector_store %arg10[%c0_48, %c0_49, %c0_50], %83 {strides = array<i32>} : memref<1x16x8xf32, #tpu.memory_space<vmem>>, vector<1x16x8xf32>,
    return
  }
  func.func @transform_0(%arg0: i32) -> (i32, i32, i32) {
    %c0_i32 = arith.constant 0 : i32
    %c0_i32_0 = arith.constant 0 : i32
    %c0_i32_1 = arith.constant 0 : i32
    return %arg0, %c0_i32, %c0_i32_0 : i32, i32, i32
  }
  func.func @transform_1(%arg0: i32) -> (i32, i32, i32) {
    %c0_i32 = arith.constant 0 : i32
    %c0_i32_0 = arith.constant 0 : i32
    %c0_i32_1 = arith.constant 0 : i32
    return %arg0, %c0_i32, %c0_i32_0 : i32, i32, i32
  }
  func.func @transform_2(%arg0: i32) -> (i32, i32, i32) {
    %c0_i32 = arith.constant 0 : i32
    %c0_i32_0 = arith.constant 0 : i32
    %c0_i32_1 = arith.constant 0 : i32
    return %arg0, %c0_i32, %c0_i32_0 : i32, i32, i32
  }
  func.func @transform_3(%arg0: i32) -> (i32, i32) {
    %c0_i32 = arith.constant 0 : i32
    %c0_i32_0 = arith.constant 0 : i32
    %c0_i32_1 = arith.constant 0 : i32
    return %c0_i32, %c0_i32_0 : i32, i32
  }
  func.func @transform_4(%arg0: i32) -> (i32, i32) {
    %c0_i32 = arith.constant 0 : i32
    %c0_i32_0 = arith.constant 0 : i32
    %c0_i32_1 = arith.constant 0 : i32
    return %c0_i32, %c0_i32_0 : i32, i32
  }
  func.func @transform_5(%arg0: i32) -> (i32, i32, i32) {
    %c0_i32 = arith.constant 0 : i32
    %c0_i32_0 = arith.constant 0 : i32
    %c0_i32_1 = arith.constant 0 : i32
    %c0_i32_2 = arith.constant 0 : i32
    return %c0_i32, %c0_i32_0, %c0_i32_1 : i32, i32, i32
  }
  func.func @transform_6(%arg0: i32) -> (i32, i32) {
    %c0_i32 = arith.constant 0 : i32
    %c0_i32_0 = arith.constant 0 : i32
    %c0_i32_1 = arith.constant 0 : i32
    return %c0_i32, %c0_i32_0 : i32, i32
  }
  func.func @transform_7(%arg0: i32) -> (i32, i32) {
    %c0_i32 = arith.constant 0 : i32
    %c0_i32_0 = arith.constant 0 : i32
    %c0_i32_1 = arith.constant 0 : i32
    return %c0_i32, %c0_i32_0 : i32, i32
  }
  func.func @transform_8(%arg0: i32) -> (i32, i32) {
    %c0_i32 = arith.constant 0 : i32
    %c0_i32_0 = arith.constant 0 : i32
    %c0_i32_1 = arith.constant 0 : i32
    return %c0_i32, %c0_i32_0 : i32, i32
  }
  func.func @transform_9(%arg0: i32) -> (i32, i32, i32) {
    %c0_i32 = arith.constant 0 : i32
    %c0_i32_0 = arith.constant 0 : i32
    %c0_i32_1 = arith.constant 0 : i32
    return %arg0, %c0_i32, %c0_i32_0 : i32, i32, i32
  }
}

</mosaic_0001>

<bundles_post_ra>
// kernel: tpu_custom_call.1
= control target key start
LH: loop header
LB: loop body
LE: loop exit
PB: predicated region body
PF: predicated region fallthrough
CT: control target
= control target key end

     0   :  { %s2559_s30 = smov 0   ;;  %s2776_s0 = inlined_call_operand.vmem [shape: f32[2,16,8], index: 0, kind: input, shape index: {}]   ;;  %s2777_s1 = inlined_call_operand.vmem [shape: f32[2,16,3], index: 1, kind: input, shape index: {}]   ;;  %s2778_s2 = inlined_call_operand.vmem [shape: s32[2,16,4], index: 2, kind: input, shape index: {}]   ;;  %s2779_s3 = inlined_call_operand.vmem [shape: f32[32,8], index: 3, kind: input, shape index: {}]   ;;  %s2780_s4 = inlined_call_operand.vmem [shape: f32[32,8], index: 4, kind: input, shape index: {}]   ;;  %s2781_s5 = inlined_call_operand.vmem [shape: f32[4,3,16], index: 5, kind: input, shape index: {}]   ;;  %s2782_s6 = inlined_call_operand.vmem [shape: f32[3,16], index: 6, kind: input, shape index: {}]   ;;  %s2783_s7 = inlined_call_operand.vmem [shape: f32[1,8], index: 7, kind: input, shape index: {}]   ;;  %s2784_s8 = inlined_call_operand.vmem [shape: f32[1,8], index: 8, kind: input, shape index: {}]   ;;  %s2785_s9 = inlined_call_operand.vmem [shape: f32[2,16,8], index: 9, kind: output, shape index: {}]  }
   0x1 LB: > { %s2118_s10 = sadd.s32 4294967295, %s2498_s30   ;;  %p2122_p0 = scmp.ge.s32.totalorder %s2498_s30, 1  ;;  %s2498_s30 = sphi %s2559_s30, %s19_s30  }
   0x2   : > { %p307_p1 = scmp.lt.s32.totalorder %s2498_s30, 3 }
   0x4   : > { %p308_p2 = pnand %p2122_p0, %p307_p1 }
   0x5   : > { %vm437_vm0 = vcmask (!%p308_p2), 1042432   ;;  %v2142_v0 = vld [vmem:[%s2781_s5 + $0x4] sm:$0x7] (!%p308_p2)  ;;  %p353_p3 = scmp.lt.s32.totalorder (!%p308_p2), %s2118_s10, 1  ;;  %v429_v1 = vld [vmem:[%s2781_s5] sm:$0x7] (!%p308_p2)  ;;  %v379_v16 = vlaneseq (!%p308_p2) }
   0x6   : > { %311 = sbr.rel (%p308_p2) target bundleno = 1384 (0x568), region = 56  ;;  %2273 = vmatprep.subr.msk.mxu1 (!%p308_p2), %vm437_vm0, %v2142_v0  ;;  %v2150_v2 = vld [vmem:[%s2781_s5 + $0x8] sm:$0x7] (!%p308_p2)  ;;  %v2500_v3 = vmov (!%p308_p2), 1   ;;  %2268 = vmatprep.subr.msk.mxu0 (!%p308_p2), %vm437_vm0, %v429_v1  ;;  %vm430_vm1 = vcmask (!%p308_p2), 23552   ;;  %v2501_v4 = vmov (!%p308_p2), 0  }
   0x7   : > { %2486 = vset.pattern.permute.xlu0 (!%p308_p2), %v2500_v3  ;;  %2274 = vmatpush3.msk.msra.mxu1 (!%p308_p2), %vm437_vm0, %v2142_v0  ;;  %v2156_v7 = vld [vmem:[%s2781_s5 + $0xc] sm:$0x7] (!%p308_p2)  ;;  %v2502_v10 = vmov (!%p308_p2), 2   ;;  %v2503_v11 = vmov (!%p308_p2), 3   ;;  %v1085_v15 = vld [vmem:[%s2782_s6] sm:$0x7] (!%p308_p2) }
   0x8   : > { %2269 = vmatpush3.msk.msra.mxu0 (!%p308_p2), %vm437_vm0, %v429_v1  ;;  %2292 = vmatprep.subr.msk.mxu1 (!%p308_p2), %vm437_vm0, %v2150_v2  ;;  %v380_v17 = vand.u32 (!%p308_p2), 127, %v379_v16  ;;  %vm596_vm2 = vcmask (!%p308_p2), 130048   ;;  %v2504_v20 = vmov (!%p308_p2), 0.0   ;;  %s2505_s11 = smov (!%p308_p2), 16   ;;  %v1507_v53 = vld [vmem:[%s2779_s3] sm:$0xff] (!%p308_p2)  ;;  %v1508_v54 = vld [vmem:[%s2779_s3 + $0x8] sm:$0xff] (!%p308_p2) }
   0x9   : > { %2487 = vset.pattern.permute.xlu1 (!%p308_p2), %v2501_v4  ;;  %v2431_v55 = vpack.c.bf16 (!%p308_p2), %v1508_v54, %v1507_v53  ;;  %v1509_v56 = vld [vmem:[%s2779_s3 + $0x10] sm:$0xff] (!%p308_p2)  ;;  %v1510_v57 = vld [vmem:[%s2779_s3 + $0x18] sm:$0xff] (!%p308_p2)  ;;  %s2506_s21 = smov (!%p308_p2), 8   ;;  %s2507_s22 = smov (!%p308_p2), 24   ;;  %vm1490_vm11 = vcmask (!%p308_p2), 64512   ;;  %vm1495_vm12 = vcmask (!%p308_p2), 195584  }
   0xa   : > { %v2435_v58 = vpack.c.bf16 (!%p308_p2), %v1510_v57, %v1509_v56  ;;  %vm1511_vm13 = vcmask (!%p308_p2), 261120   ;;  %s2508_s14 = smov (!%p308_p2), 120   ;;  %v2184_v53 = vld [vmem:[%s2784_s8] ss:$0 sm:$0xff] (!%p308_p2) }
   0xd   : > { %s2787_s10 = smov (!%p353_p3, %s2118_s10), 1 }
   0xe   : > { %s2581_s17 = sshll.u32 %s2787_s10, 4 }
   0xf   : > { %s362_s20 = scalar_lea.vmem %s2777_s1, %s2581_s17  ;;  %s367_s23 = scalar_lea.vmem %s2778_s2, %s2581_s17 }
  0x10   : > { %v375_v5 = vld [vmem:[%s362_s20] sm:$0xff]  ;;  %v376_v6 = vld [vmem:[%s362_s20 + $0x8] sm:$0xff]  ;;  %s357_s28 = scalar_lea.vmem %s2776_s0, %s2581_s17  ;;  %s372_s19 = scalar_lea.vmem %s2785_s9, %s2581_s17 }
  0x11   : > { %2275 = vmatprep.mubr.msk.f32.mxu1 %vm430_vm1, %v375_v5  ;;  %2270 = vmatprep.mubr.msk.f32.mxu0 %vm430_vm1, %v375_v5  ;;  %v377_v8 = vld [vmem:[%s367_s23] sm:$0xff]  ;;  %v378_v9 = vld [vmem:[%s367_s23 + $0x8] sm:$0xff] }
  0x12   : > { %2276 = vmatmul.mubr.msk.f32.vlgmr.msra.gmra.mrb[0].mxu1 %vm430_vm1, %v376_v6  ;;  %2271 = vmatmul.mubr.msk.f32.vlgmr.msra.gmra.mrb[0].mxu0 %vm430_vm1, %v376_v6  ;;  %v2610_v12 = vld [vmem:[%s357_s28] sm:$0xff]  ;;  %v2612_v13 = vld [vmem:[%s357_s28 + $0x8] sm:$0xff] }
  0x13   : > { %2293 = vmatpush3.msk.msra.mxu1 %vm437_vm0, %v2150_v2  ;;  %2294 = vmatprep.mubr.msk.f32.mxu1 %vm430_vm1, %v375_v5  ;;  %v2616_v14 = vpack.c.bf16 %v2612_v13, %v2610_v12 }
  0x14   : > { %2304 = vmatprep.subr.msk.mxu1 %vm437_vm0, %v2156_v7  ;;  %394 = vperm.xlu0 %2486, %v377_v8  }
  0x15   : > { %382 = vperm.xlu1 %2487, %v377_v8  }
  0x16   : > { %2295 = vmatmul.mubr.msk.f32.vlgmr.msra.gmra.mrb[2].mxu1 %vm430_vm1, %v376_v6 }
  0x17   : > { %2305 = vmatpush3.msk.msra.mxu1 %vm437_vm0, %v2156_v7  ;;  %2306 = vmatprep.mubr.msk.f32.mxu1 %vm430_vm1, %v375_v5 }
  0x18   : > { %397 = vperm.xlu0 %2486, %v378_v9   ;;  %2316 = vmatprep.subr.msk.mxu1 %vm437_vm0, %v1085_v15 }
  0x19   : > { %385 = vperm.xlu1 %2487, %v378_v9  }
  0x1a   : > { %2307 = vmatmul.mubr.msk.f32.vlgmr.msra.gmra.mrb[4].mxu1 %vm430_vm1, %v376_v6 }
  0x1b   : > { %2318 = vmatprep.mubr.msk.f32.mxu1 %vm430_vm1, %v375_v5  ;;  %2317 = vmatpush3.msk.msra.mxu1 %vm437_vm0, %v1085_v15 }
  0x1c   : > { %2488 = vset.pattern.permute.xlu0 %v2502_v10  ;;  %2416 = vmatprep.subr.bf16.mxu1 %v2616_v14 }
  0x1d   : > { %2489 = vset.pattern.permute.xlu1 %v2502_v10  ;;  %406 = vperm.xlu0 %2488, %v377_v8  }
  0x1e   : > { %409 = vperm.xlu1 %2489, %v378_v9   ;;  %2319 = vmatmul.mubr.msk.f32.vlgmr.msra.gmra.mrb[6].mxu1 %vm430_vm1, %v376_v6 }
  0x1f   : > { %2418 = vmatpush3.bf16.msra.mxu1 %v2616_v14 }
  0x20   : > { %2424 = vmatprep.subr.bf16.mxu1 %v2616_v14 }
  0x21   : > { %2491 = vset.pattern.permute.xlu0 %v2503_v11 }
  0x22   : > { %2490 = vset.pattern.permute.xlu1 %v2503_v11  ;;  %421 = vperm.xlu0 %2491, %v378_v9  }
  0x23   : > { %418 = vperm.xlu1 %2490, %v377_v8  }
  0x93   : > { %v395_v18 = vpop.permute.xlu0 %394 }
  0x94   : > { %vm399_vm3 = vcmp.eq.s32.totalorder %v395_v18, %v380_v17  ;;  %v383_v19 = vpop.permute.xlu1 %382 }
  0x95   : > { %v2627_v21 = vsel %vm399_vm3, 1.0, %v2504_v20  ;;  %vm387_vm4 = vcmp.eq.s32.totalorder %v383_v19, %v380_v17 }
  0x96   : > { %v2131_v22 = vsel %vm387_vm4, 1.0, %v2504_v20  ;;  %2282 = vmatprep.mubr.msk.f32.mxu0 %vm596_vm2, %v2627_v21 }
  0x97   : > { %v398_v23 = vpop.permute.xlu0 %397  ;;  %2325 = vmatprep.mubr.msk.f32.mxu1 %vm596_vm2, %v2131_v22 }
  0x98   : > { %vm400_vm5 = vcmp.eq.s32.totalorder %v398_v23, %v380_v17  ;;  %v386_v24 = vpop.permute.xlu1 %385 }
  0x99   : > { %v2632_v25 = vsel %vm400_vm5, 1.0, %v2504_v20  ;;  %vm388_vm6 = vcmp.eq.s32.totalorder %v386_v24, %v380_v17 }
  0x9a   : > { %v2634_v26 = vsel %vm388_vm6, 1.0, %v2504_v20 }
  0x9b   : > { %2326 = vmatmul.mubr.msk.f32.vlgmr.msra.gmra.mrb[8].mxu1 %vm596_vm2, %v2634_v26 }
  0x9c   : > { %v407_v27 = vpop.permute.xlu0 %406  ;;  %2426 = vmatpush3.bf16.msra.mxu1 %v2616_v14 }
  0x9d   : > { %vm411_vm7 = vcmp.eq.s32.totalorder %v407_v27, %v380_v17  ;;  %v410_v28 = vpop.permute.xlu1 %409  ;;  %2432 = vmatprep.subr.bf16.mxu1 %v2431_v55 }
  0x9e   : > { %v2639_v29 = vsel %vm411_vm7, 1.0, %v2504_v20  ;;  %vm412_vm8 = vcmp.eq.s32.totalorder %v410_v28, %v380_v17 }
  0x9f   : > { %v2641_v30 = vsel %vm412_vm8, 1.0, %v2504_v20  ;;  %2339 = vmatprep.mubr.msk.f32.mxu1 %vm596_vm2, %v2639_v29 }
  0xa0   : > { %2340 = vmatmul.mubr.msk.f32.vlgmr.msra.gmra.mrb[10].mxu1 %vm596_vm2, %v2641_v30 }
  0xa1   : > { %v422_v31 = vpop.permute.xlu0 %421  ;;  %2434 = vmatpush3.bf16.msra.mxu1 %v2431_v55 }
  0xa2   : > { %v419_v32 = vpop.permute.xlu1 %418  ;;  %vm424_vm9 = vcmp.eq.s32.totalorder %v422_v31, %v380_v17  ;;  %2436 = vmatprep.subr.bf16.mxu1 %v2435_v58 }
  0xa3   : > { %vm423_vm10 = vcmp.eq.s32.totalorder %v419_v32, %v380_v17  ;;  %v2647_v33 = vsel %vm424_vm9, 1.0, %v2504_v20  ;;  %v2173_v17 = vld [vmem:[%s2783_s7] ss:$0 sm:$0xff] }
  0xa4   : > { %v2649_v34 = vsel %vm423_vm10, 1.0, %v2504_v20 }
  0xa5   : > { %2438 = vmatpush3.bf16.msra.mxu1 %v2435_v58 }
  0xe5   : > { %v2277_v35 = vpop.f32.mrb[0].mxu1  ;;  %v2272_v36 = vpop.f32.mrb[0].mxu0 }
  0xe6   : > { %v587_v37 = vpop.f32.mrb[1].mxu1  ;;  %v507_v38 = vpop.f32.mrb[1].mxu0 }
  0xe7   : > { %v2399_v39 = vpack.c.bf16 %v2277_v35, %v587_v37  ;;  %v2403_v40 = vpack.c.bf16 %v2272_v36, %v507_v38 }
  0xe9   : > { %2400 = vmatprep.subr.bf16.mxu0 %v2399_v39  ;;  %v2296_v41 = vpop.f32.mrb[2].mxu1 }
  0xea   : > { %2402 = vmatpush3.bf16.msra.mxu0 %v2399_v39  ;;  %v830_v42 = vpop.f32.mrb[3].mxu1 }
  0xeb   : > { %2404 = vmatprep.subr.bf16.mxu0 %v2403_v40  ;;  %v2407_v43 = vpack.c.bf16 %v2296_v41, %v830_v42 }
  0xed   : > { %2283 = vmatmul.mubr.msk.f32.vlgmr.msra.gmra.mrb[2].mxu0 %vm596_vm2, %v2632_v25  ;;  %v2308_v44 = vpop.f32.mrb[4].mxu1 }
  0xee   : > { %2406 = vmatpush3.bf16.msra.mxu0 %v2403_v40  ;;  %2289 = vmatprep.mubr.msk.f32.mxu0 %vm596_vm2, %v2131_v22  ;;  %v993_v45 = vpop.f32.mrb[5].mxu1 }
  0xef   : > { %2408 = vmatprep.subr.bf16.mxu0 %v2407_v43  ;;  %v2411_v46 = vpack.c.bf16 %v2308_v44, %v993_v45 }
  0xf1   : > { %v2320_v47 = vpop.f32.mrb[6].mxu1 }
  0xf2   : > { %v1155_v48 = vpop.f32.mrb[7].mxu1 }
  0xf5   : > { %2290 = vmatmul.mubr.msk.f32.vlgmr.msra.gmra.mrb[2].mxu0 %vm596_vm2, %v2634_v26 }
  0xf6   : > { %2410 = vmatpush3.bf16.msra.mxu0 %v2407_v43  ;;  %2301 = vmatprep.mubr.msk.f32.mxu0 %vm596_vm2, %v2639_v29 }
  0xf7   : > { %2412 = vmatprep.subr.bf16.mxu0 %v2411_v46 }
  0xfd   : > { %2302 = vmatmul.mubr.msk.f32.vlgmr.msra.gmra.mrb[2].mxu0 %vm596_vm2, %v2641_v30 }
  0xfe   : > { %2414 = vmatpush3.bf16.msra.mxu0 %v2411_v46  ;;  %2313 = vmatprep.mubr.msk.f32.mxu0 %vm596_vm2, %v2649_v34 }
  0xff   : > { %2420 = vmatprep.subr.bf16.mxu0 %v2616_v14 }
 0x105   : > { %2314 = vmatmul.mubr.msk.f32.vlgmr.msra.gmra.mrb[2].mxu0 %vm596_vm2, %v2647_v33 }
 0x106   : > { %2422 = vmatpush3.bf16.msra.mxu0 %v2616_v14  ;;  %2332 = vmatprep.mubr.msk.f32.mxu0 %vm596_vm2, %v2627_v21 }
 0x107   : > { %2428 = vmatprep.subr.bf16.mxu0 %v2616_v14 }
 0x109   : > { %2333 = vmatmul.mubr.msk.f32.vlgmr.msra.gmra.mrb[4].mxu0 %vm596_vm2, %v2632_v25 }
 0x10a   : > { %2430 = vmatpush3.bf16.msra.mxu0 %v2616_v14  ;;  %2346 = vmatprep.mubr.msk.f32.mxu0 %vm596_vm2, %v2649_v34 }
 0x10d   : > { %2347 = vmatmul.mubr.msk.f32.vlgmr.msra.gmra.mrb[6].mxu0 %vm596_vm2, %v2647_v33 }
 0x10e   : > { %2364 = vmatprep.mubr.msk.f32.mxu0 %vm596_vm2, %v2131_v22 }
 0x16e   : > { %v2327_v49 = vpop.f32.mrb[8].mxu1 }
 0x16f   : > { %v1232_v50 = vpop.f32.mrb[9].mxu1 }
 0x173   : > { %v2341_v51 = vpop.f32.mrb[10].mxu1 }
 0x174   : > { %v1382_v52 = vpop.f32.mrb[11].mxu1  ;;  %1478 = vrot.lane.b32.xlu1 %v2341_v51, %s2505_s11 }
 0x175   : > { %1476 = vrot.lane.b32.xlu0 %v1382_v52, %s2505_s11 }
 0x1d8   : > { %v2315_v59 = vpop.f32.mrb[2].mxu0 }
 0x1d9   : > { %v2691_v60 = vsub.f32 %v2320_v47, %v2315_v59  ;;  %v1074_v61 = vpop.f32.mrb[3].mxu0 }
 0x1da   : > { %v2693_v62 = vsub.f32 %v1155_v48, %v1074_v61 }
 0x1db   : > { %v1506_v18 = vadd.f32 %v2173_v17, %v2691_v60 }
 0x1dc   : > { %v2334_v63 = vpop.f32.mrb[4].mxu0  ;;  %v1505_v20 = vadd.f32 %v2173_v17, %v2693_v62 }
 0x1dd   : > { %v1307_v0 = vpop.f32.mrb[5].mxu0  ;;  %1470 = vrot.lane.b32.xlu1 %v2334_v63, %s2506_s21 }
 0x1e0   : > { %v2348_v1 = vpop.f32.mrb[6].mxu0 }
 0x1e1   : > { %v1457_v2 = vpop.f32.mrb[7].mxu0  ;;  %1468 = vrot.lane.b32.xlu1 %v1307_v0, %s2506_s21 }
 0x1e2   : > { %1484 = vrot.lane.b32.xlu0 %v1457_v2, %s2507_s22 }
 0x1e5   : > { %1486 = vrot.lane.b32.xlu1 %v2348_v1, %s2507_s22 }
 0x1e6   : > { %v1479_v3 = vpop.permute.xlu1 %1478 }
 0x1e7   : > { %v1477_v5 = vpop.permute.xlu0 %1476 }
 0x24f   : > { %v1471_v4 = vpop.permute.xlu1 %1470 }
 0x250   : > { %v1492_v7 = vsel %vm1490_vm11, %v2327_v49, %v1471_v4 }
 0x251   : > { %v1494_v14 = vsel %vm596_vm2, %v1492_v7, %v1479_v3 }
 0x253   : > { %v1469_v6 = vpop.permute.xlu1 %1468 }
 0x254   : > { %v1491_v8 = vsel %vm1490_vm11, %v1232_v50, %v1469_v6  ;;  %v1485_v9 = vpop.permute.xlu0 %1484 }
 0x255   : > { %v1493_v10 = vsel %vm596_vm2, %v1491_v8, %v1477_v5 }
 0x256   : > { %v1496_v11 = vsel %vm1495_vm12, %v1493_v10, %v1485_v9 }
 0x257   : > { %v1487_v15 = vpop.permute.xlu1 %1486  ;;  %2357 = vmatprep.mubr.msk.f32.mxu1 %vm1511_vm13, %v1496_v11 }
 0x258   : > { %v1497_v16 = vsel %vm1495_vm12, %v1494_v14, %v1487_v15 }
 0x259   : > { %2358 = vmatmul.mubr.msk.f32.vlgmr.msra.gmra.mrb[12].mxu1 %vm1511_vm13, %v1497_v16 }
 0x25a   : > { %2378 = vmatprep.mubr.msk.f32.mxu1 %vm596_vm2, %v2639_v29 }
 0x32c   : > { %v2359_v19 = vpop.f32.mrb[12].mxu1 }
 0x32d   : > { %v1594_v22 = vadd.f32 %v2359_v19, %v1506_v18  ;;  %v1584_v23 = vpop.f32.mrb[13].mxu1 }
 0x32e   : > { %v1593_v24 = vadd.f32 %v1584_v23, %v1505_v20 }
 0x32f   : > { %v1596_v27 = vmax.f32 %v1594_v22, 0.0 }
 0x330   : > { %v1595_v28 = vmax.f32 %v1593_v24, 0.0 }
 0x331   : > { %v2715_v31 = vadd.f32 %v1596_v27, %v2612_v13  ;;  %v1947_v13 = vld [vmem:[%s2780_s4 + $0x8] sm:$0xff] }
 0x332   : > { %v2718_v32 = vadd.f32 %v1595_v28, %v2610_v12  ;;  %v1946_v12 = vld [vmem:[%s2780_s4] sm:$0xff] }
 0x334   : > { %v2439_v29 = vpack.c.bf16 %v2715_v31, %v2718_v32 }
 0x336   : > { %2440 = vmatprep.subr.bf16.mxu0 %v2439_v29  ;;  %2448 = vmatprep.subr.bf16.mxu1 %v2439_v29 }
 0x337   : > { %2442 = vmatpush3.bf16.msra.mxu0 %v2439_v29  ;;  %2450 = vmatpush3.bf16.msra.mxu1 %v2439_v29 }
 0x338   : > { %2444 = vmatprep.subr.bf16.mxu0 %v2439_v29 }
 0x33a   : > { %2365 = vmatmul.mubr.msk.f32.vlgmr.msra.gmra.mrb[8].mxu0 %vm596_vm2, %v2634_v26  ;;  %2379 = vmatmul.mubr.msk.f32.vlgmr.msra.gmra.mrb[14].mxu1 %vm596_vm2, %v2641_v30  ;;  %v1949_v26 = vld [vmem:[%s2780_s4 + $0x18] sm:$0xff] }
 0x33b   : > { %2446 = vmatpush3.bf16.msra.mxu0 %v2439_v29  ;;  %2371 = vmatprep.mubr.msk.f32.mxu0 %vm596_vm2, %v2627_v21  ;;  %v2455_v21 = vpack.c.bf16 %v1947_v13, %v1946_v12 }
 0x33c   : > { %2452 = vmatprep.subr.bf16.mxu0 %v2439_v29 }
 0x33d   : > { %2456 = vmatprep.subr.bf16.mxu1 %v2455_v21 }
 0x33e   : > { %2372 = vmatmul.mubr.msk.f32.vlgmr.msra.gmra.mrb[10].mxu0 %vm596_vm2, %v2632_v25  ;;  %2458 = vmatpush3.bf16.msra.mxu1 %v2455_v21  ;;  %v1948_v25 = vld [vmem:[%s2780_s4 + $0x10] sm:$0xff] }
 0x33f   : > { %2454 = vmatpush3.bf16.msra.mxu0 %v2439_v29  ;;  %2385 = vmatprep.mubr.msk.f32.mxu0 %vm596_vm2, %v2649_v34  ;;  %v2459_v30 = vpack.c.bf16 %v1949_v26, %v1948_v25 }
 0x341   : > { %2460 = vmatprep.subr.bf16.mxu1 %v2459_v30 }
 0x342   : > { %2386 = vmatmul.mubr.msk.f32.vlgmr.msra.gmra.mrb[12].mxu0 %vm596_vm2, %v2647_v33  ;;  %2462 = vmatpush3.bf16.msra.mxu1 %v2459_v30 }
 0x40d   : > { %v2366_v33 = vpop.f32.mrb[8].mxu0  ;;  %v2380_v34 = vpop.f32.mrb[14].mxu1 }
 0x40e   : > { %1911 = vrot.lane.b32.xlu1 %v2380_v34, %s2505_s11  ;;  %v1665_v35 = vpop.f32.mrb[9].mxu0  ;;  %v1815_v36 = vpop.f32.mrb[15].mxu1 }
 0x40f   : > { %1909 = vrot.lane.b32.xlu0 %v1815_v36, %s2505_s11 }
 0x411   : > { %v2373_v37 = vpop.f32.mrb[10].mxu0 }
 0x412   : > { %1903 = vrot.lane.b32.xlu1 %v2373_v37, %s2506_s21  ;;  %v1740_v38 = vpop.f32.mrb[11].mxu0 }
 0x413   : > { %1901 = vrot.lane.b32.xlu0 %v1740_v38, %s2506_s21 }
 0x415   : > { %v2387_v39 = vpop.f32.mrb[12].mxu0 }
 0x416   : > { %1919 = vrot.lane.b32.xlu1 %v2387_v39, %s2507_s22  ;;  %v1890_v40 = vpop.f32.mrb[13].mxu0 }
 0x417   : > { %1917 = vrot.lane.b32.xlu0 %v1890_v40, %s2507_s22 }
 0x41a   : > { %1940 = vrot.lane.b32.xlu1 %v2691_v60, %s2508_s14 }
 0x41b   : > { %1938 = vrot.lane.b32.xlu0 %v2693_v62, %s2508_s14 }
 0x480   : > { %v1912_v41 = vpop.permute.xlu1 %1911 }
 0x481   : > { %v1910_v42 = vpop.permute.xlu0 %1909 }
 0x484   : > { %v1904_v43 = vpop.permute.xlu1 %1903 }
 0x485   : > { %v1902_v44 = vpop.permute.xlu0 %1901  ;;  %v1924_v46 = vsel %vm1490_vm11, %v2366_v33, %v1904_v43 }
 0x486   : > { %v1923_v45 = vsel %vm1490_vm11, %v1665_v35, %v1902_v44  ;;  %v1926_v50 = vsel %vm596_vm2, %v1924_v46, %v1912_v41 }
 0x487   : > { %v1925_v48 = vsel %vm596_vm2, %v1923_v45, %v1910_v42 }
 0x488   : > { %v1920_v47 = vpop.permute.xlu1 %1919 }
 0x489   : > { %v1918_v49 = vpop.permute.xlu0 %1917  ;;  %v1928_v52 = vsel %vm1495_vm12, %v1926_v50, %v1920_v47 }
 0x48a   : > { %v1927_v51 = vsel %vm1495_vm12, %v1925_v48, %v1918_v49 }
 0x48b   : > { %2396 = vmatprep.mubr.msk.f32.mxu1 %vm1511_vm13, %v1927_v51 }
 0x48c   : > { %2397 = vmatmul.mubr.msk.f32.vlgmr.msra.gmra.mrb[16].mxu1 %vm1511_vm13, %v1928_v52  ;;  %v1941_v54 = vpop.permute.xlu1 %1940 }
 0x48d   : > { %v1939_v55 = vpop.permute.xlu0 %1938  ;;  %v1945_v56 = vadd.f32 %v2184_v53, %v1941_v54 }
 0x48e   : > { %v1944_v57 = vadd.f32 %v2184_v53, %v1939_v55 }
 0x55f   : > { %v2398_v58 = vpop.f32.mrb[16].mxu1 }
 0x560   : > { %v2032_v59 = vadd.f32 %v2398_v58, %v1945_v56  ;;  %v2022_v60 = vpop.f32.mrb[17].mxu1 }
 0x561   : > { %v2031_v61 = vadd.f32 %v2022_v60, %v1944_v57 }
 0x562   : > { %v2034_v62 = vmax.f32 %v2032_v59, 0.0 }
 0x563   : > { %v2033_v63 = vmax.f32 %v2031_v61, 0.0 }
 0x564   : > { %v2036_v0 = vadd.f32 %v2034_v62, %v2715_v31 }
 0x565   : > { %v2035_v1 = vadd.f32 %v2033_v63, %v2718_v32 }
 0x566   : > { %2038 = vst.msk [vmem:[%s372_s19 + $0x8] sm:$0xff] %vm1490_vm11, %v2036_v0 }
 0x567   : > { %2037 = vst.msk [vmem:[%s372_s19] sm:$0xff] %vm1490_vm11, %v2035_v1 }
 0x568 PF: > { %s19_s30 = sadd.s32 1, %s2498_s30  }
 0x569   : > { %p16_p4 = scmp.ge.s32.totalorder %s19_s30, 4  }
 0x56b   :  { %18 = sbr.rel (!%p16_p4) target bundleno = 1 (0x1), region = 95 }

</bundles_post_ra>
